<compile_context>
chip_gen: v7x
topology: tpu7x:2x2x1
jax: 0.10.0
libtpu: 0.0.40
codegen_flags: <defaults>
</compile_context>

<pallas_src>
import functools

import jax
import jax.numpy as jnp
from jax import lax
from jax.experimental import pallas as pl
from jax.experimental.pallas import tpu as pltpu

EPS = 1e-5


def _matrix_tree_kernel(lengths_ref, x_ref, out_ref, m_ref, *, n, bt):
    g = pl.program_id(0)

    rows = lax.broadcasted_iota(jnp.int32, (n, n), 0)
    cols = lax.broadcasted_iota(jnp.int32, (n, n), 1)
    eye = rows == cols
    eye_f = eye.astype(jnp.float32)
    row_idx_col = lax.broadcasted_iota(jnp.int32, (n, 1), 0)   # (n, 1)
    col_idx_row = lax.broadcasted_iota(jnp.int32, (1, n), 1)   # (1, n)

    def batch_body(i, carry):
        lx = jnp.minimum(lengths_ref[g * bt + i], n)           # valid prefix length
        x = x_ref[i]                                           # (n, n) f32 scores
        exp_x = jnp.exp(x)
        valid = (rows < lx) & (cols < lx)

        # ---- build the (identity-padded) Laplacian ---------------------------
        lap0 = jnp.where(valid & jnp.logical_not(eye), exp_x + EPS, 0.0)
        colsum = jnp.sum(lap0, axis=0, keepdims=True)          # (1, n) column sums
        lap = -lap0 + eye_f * colsum
        diag_exp_row = jnp.sum(jnp.where(eye, exp_x, 0.0),
                               axis=0, keepdims=True)          # (1, n): exp(x[j, j])
        lap = jnp.where(rows == 0, diag_exp_row, lap)          # row 0 <- exp(diag)
        lap = jnp.where(valid, lap, eye_f)                     # identity padding
        m_ref[...] = lap

        # ---- in-place Gauss-Jordan inversion on the (n, n) VMEM scratch ------
        # Step k folds pivot-row normalization AND the inverse-column overwrite
        # into a single rank-1 update  M <- M - c' r'  with
        #   c'[i] = M[i,k] (i != k),   c'[k] = p - 1
        #   r'[j] = M[k,j]/p (j != k), r'[k] = 1 + 1/p
        # leaving column k holding the k-th column of the inverse.
        def gj_step(k, inner_carry):
            M = m_ref[...]                                     # (n, n)
            onehot = (row_idx_col == k).astype(jnp.float32)    # (n, 1), one-hot at k
            # column k via the otherwise-idle MXU; HIGHEST keeps it exact f32
            c = jnp.dot(M, onehot, preferred_element_type=jnp.float32,
                        precision=lax.Precision.HIGHEST)       # (n, 1)
            pivot = jnp.sum(c * onehot)                        # scalar M[k, k] (exact)
            inv_p = 1.0 / pivot
            row_k = m_ref[pl.ds(k, 1), :]                      # (1, n) pivot row
            r = row_k * inv_p
            r = jnp.where(col_idx_row == k, 1.0 + inv_p, r)    # r'[k] = 1 + 1/p
            cprime = jnp.where(row_idx_col == k, pivot - 1.0, c)
            m_ref[...] = M - cprime * r
            return inner_carry

        # pivots k >= lx act on the identity padding and are exact no-ops,
        # so looping only to lx is both faster and equivalent.
        lax.fori_loop(0, lx, gj_step, 0)
        inv_lap = m_ref[...]                                   # (n, n) inverse

        # ---- assemble marginals (one-time O(n^2) work) ------------------------
        inv_diag = jnp.sum(jnp.where(eye, inv_lap, 0.0),
                           axis=0, keepdims=True)              # (1, n): inv[j, j]
        term1 = exp_x * inv_diag                               # exp(x[i,j]) * inv[j,j]
        term2 = exp_x * inv_lap.T                              # exp(x[i,j]) * inv[j,i]
        term1 = jnp.where(cols == 0, 0.0, term1)               # term1[:, 0] = 0
        term2 = jnp.where(rows == 0, 0.0, term2)               # term2[0]    = 0
        out = term1 - term2
        # roots: out[j, j] += exp(x[j, j]) * inv_lap[j, 0]
        out = out + eye_f * exp_x * inv_lap[:, 0:1]
        out = jnp.where(valid, out, 0.0)                       # zero outside lx block
        out_ref[i] = out
        return carry

    lax.fori_loop(0, bt, batch_body, 0, unroll=False)


def matrix_tree(x, lengths=None, *, block_b=None):
    """Pallas-TPU equivalent of MatrixTree.forward(input, lengths)."""
    x = x.astype(jnp.float32)
    B, n, n2 = x.shape
    assert n == n2, "score matrices must be square"

    if lengths is None:
        lengths = jnp.full((B,), n, dtype=jnp.int32)
    lengths = lengths.astype(jnp.int32)

    if block_b is None:
        # Amortize the ~0.35us/grid-step overhead, but keep the grid >= 2 when
        # B >= 2 so the "parallel" batch axis can shard over v7x's 2 TensorCores.
        block_b = max(1, min(8, (B + 1) // 2))
        # VMEM cap: pipeline buffers cost ~16 * block_b * n^2 bytes (in+out,
        # double-buffered); keep under ~24 MiB so v7x (64 MiB physical VMEM) fits.
        vmem_cap = max(1, (24 << 20) // (16 * n * n))
        block_b = min(block_b, vmem_cap)

    bp = ((B + block_b - 1) // block_b) * block_b
    if bp != B:
        # pad with zero-length elements (their output is all zeros), trim after
        x = jnp.concatenate([x, jnp.zeros((bp - B, n, n), jnp.float32)], axis=0)
        lengths = jnp.concatenate([lengths, jnp.zeros((bp - B,), jnp.int32)], axis=0)

    kernel = functools.partial(_matrix_tree_kernel, n=n, bt=block_b)
    cost = pl.CostEstimate(
        flops=int(2 * bp * n ** 3 + 12 * bp * n * n),   # VALU-equivalent GJ + epilogue
        transcendentals=int(bp * n * n),                # exp(x)
        bytes_accessed=int(2 * bp * n * n * 4),
    )
    out = pl.pallas_call(
        kernel,
        out_shape=jax.ShapeDtypeStruct((bp, n, n), jnp.float32),
        grid_spec=pltpu.PrefetchScalarGridSpec(
            num_scalar_prefetch=1,                      # lengths -> SMEM
            grid=(bp // block_b,),
            in_specs=[pl.BlockSpec((block_b, n, n), lambda g, lens: (g, 0, 0))],
            out_specs=pl.BlockSpec((block_b, n, n), lambda g, lens: (g, 0, 0)),
            scratch_shapes=[pltpu.VMEM((n, n), jnp.float32)],   # in-place GJ buffer
        ),
        compiler_params=pltpu.CompilerParams(
            # batch axis is embarrassingly parallel -> v7x shards it over 2 TCs
            dimension_semantics=("parallel",),
        ),
        cost_estimate=cost,
    )(lengths, x)
    return out[:B] if bp != B else out


# ---- pure-JAX reference (mirrors the PyTorch code) for a correctness check ----
def matrix_tree_ref(x, lengths):
    B, n, _ = x.shape
    outs = []
    for b in range(B):
        lx = int(lengths[b])
        xb = x[b, :lx, :lx]
        lap = (jnp.exp(xb) + EPS) * (1.0 - jnp.eye(lx))
        lap = -lap + jnp.diag(lap.sum(0))
        lap = lap.at[0].set(jnp.exp(jnp.diag(xb)))
        inv = jnp.linalg.inv(lap)
        factor = jnp.broadcast_to(jnp.diag(inv)[None, :], (lx, lx))
        term1 = jnp.exp(xb) * factor
        term2 = jnp.exp(xb) * inv.T
        term1 = term1.at[:, 0].set(0.0)
        term2 = term2.at[0].set(0.0)
        ob = term1 - term2
        roots = jnp.exp(jnp.diag(xb)) * inv.T[0]
        ob = ob + jnp.diag(roots)
        outs.append(jnp.zeros((n, n), jnp.float32).at[:lx, :lx].set(ob))
    return jnp.stack(outs)


if __name__ == "__main__":
    key = jax.random.PRNGKey(0)
    B, N = 2, 8
    x = jax.random.normal(key, (B, N, N), dtype=jnp.float32)
    lengths = jnp.array([8, 6], dtype=jnp.int32)

    out = matrix_tree(x, lengths)
    jax.block_until_ready(out)

    ref = matrix_tree_ref(x, lengths)
    assert jnp.allclose(out, ref, atol=2e-3, rtol=2e-3), "mismatch vs reference"

    print("KERNEL_OK")
</pallas_src>

<mosaic_0001>
module attributes {stable_mosaic.version = 11 : i64} {
  func.func @_matrix_tree_kernel(%arg0: i32, %arg1: memref<2xi32, #tpu.memory_space<smem>>, %arg2: memref<1x8x8xf32, #tpu.memory_space<vmem>>, %arg3: memref<1x8x8xf32, #tpu.memory_space<vmem>>, %arg4: memref<8x8xf32, #tpu.memory_space<vmem>>) attributes {dimension_semantics = [#tpu.dimension_semantics<parallel>], iteration_bounds = array<i64: 2>, scalar_prefetch = 1 : i64, scratch_operands = 1 : i64, tpu.core_type = #tpu.core_type<tc>, window_params = [{transform_indices = @transform_0, window_bounds = array<i64: 1, 8, 8>}, {transform_indices = @transform_1, window_bounds = array<i64: 1, 8, 8>}]} {
    %0 = tpu.iota {dimensions = array<i32: 0>} : vector<8x8xi32>
    %1 = tpu.iota {dimensions = array<i32: 1>} : vector<8x8xi32>
    %2 = arith.cmpi eq, %0, %1 : vector<8x8xi32>
    %3 = arith.extui %2 : vector<8x8xi1> to vector<8x8xi32>
    %4 = arith.sitofp %3 : vector<8x8xi32> to vector<8x8xf32>
    %5 = tpu.iota {dimensions = array<i32: 0>} : vector<8x1xi32>
    %6 = tpu.iota {dimensions = array<i32: 1>} : vector<1x8xi32>
    %c0_i32 = arith.constant 0 : i32
    %c1_i32 = arith.constant 1 : i32
    %7 = arith.muli %arg0, %c1_i32 : i32
    %8 = arith.addi %7, %c0_i32 : i32
    %9 = arith.index_cast %8 : i32 to index
    %10 = memref.load %arg1[%9] : memref<2xi32, #tpu.memory_space<smem>>
    %c8_i32 = arith.constant 8 : i32
    %11 = arith.minsi %10, %c8_i32 : i32
    %12 = arith.index_cast %c0_i32 : i32 to index
    %c0 = arith.constant 0 : index
    %c0_0 = arith.constant 0 : index
    %13 = vector.load %arg2[%12, %c0, %c0_0] : memref<1x8x8xf32, #tpu.memory_space<vmem>>, vector<1x8x8xf32>
    %14 = vector.shape_cast %13 : vector<1x8x8xf32> to vector<8x8xf32>
    %15 = math.exp %14 : vector<8x8xf32>
    %16 = vector.broadcast %11 : i32 to vector<8x8xi32>
    %17 = arith.cmpi slt, %0, %16 : vector<8x8xi32>
    %18 = vector.broadcast %11 : i32 to vector<8x8xi32>
    %19 = arith.cmpi slt, %1, %18 : vector<8x8xi32>
    %20 = arith.andi %17, %19 : vector<8x8xi1>
    %cst = arith.constant dense<true> : vector<8x8xi1>
    %21 = arith.xori %2, %cst : vector<8x8xi1>
    %22 = arith.andi %20, %21 : vector<8x8xi1>
    %cst_1 = arith.constant 9.99999974E-6 : f32
    %23 = vector.broadcast %cst_1 : f32 to vector<8x8xf32>
    %24 = arith.addf %15, %23 : vector<8x8xf32>
    %cst_2 = arith.constant 0.000000e+00 : f32
    %25 = vector.broadcast %cst_2 : f32 to vector<8x8xf32>
    %26 = arith.select %22, %24, %25 : vector<8x8xi1>, vector<8x8xf32>
    %cst_3 = arith.constant dense<0.000000e+00> : vector<8xf32>
    %27 = vector.multi_reduction <add>, %26, %cst_3 [0] : vector<8x8xf32> to vector<8xf32>
    %28 = vector.shape_cast %27 : vector<8xf32> to vector<1x8xf32>
    %cst_4 = arith.constant 0.000000e+00 : f32
    %29 = vector.broadcast %cst_4 : f32 to vector<8x8xf32>
    %30 = arith.subf %29, %26 : vector<8x8xf32>
    %31 = vector.broadcast %28 : vector<1x8xf32> to vector<8x8xf32>
    %32 = arith.mulf %4, %31 : vector<8x8xf32>
    %33 = arith.addf %30, %32 : vector<8x8xf32>
    %cst_5 = arith.constant 0.000000e+00 : f32
    %34 = vector.broadcast %cst_5 : f32 to vector<8x8xf32>
    %35 = arith.select %2, %15, %34 : vector<8x8xi1>, vector<8x8xf32>
    %cst_6 = arith.constant dense<0.000000e+00> : vector<8xf32>
    %36 = vector.multi_reduction <add>, %35, %cst_6 [0] : vector<8x8xf32> to vector<8xf32>
    %37 = vector.shape_cast %36 : vector<8xf32> to vector<1x8xf32>
    %c0_i32_7 = arith.constant 0 : i32
    %38 = vector.broadcast %c0_i32_7 : i32 to vector<8x8xi32>
    %39 = arith.cmpi eq, %0, %38 : vector<8x8xi32>
    %40 = vector.shape_cast %37 : vector<1x8xf32> to vector<1x8xf32>
    %41 = vector.broadcast %40 : vector<1x8xf32> to vector<8x8xf32>
    %42 = arith.select %39, %41, %33 : vector<8x8xi1>, vector<8x8xf32>
    %43 = arith.select %20, %42, %4 : vector<8x8xi1>, vector<8x8xf32>
    %c0_8 = arith.constant 0 : index
    %c0_9 = arith.constant 0 : index
    %44 = vector.load %arg4[%c0_8, %c0_9] : memref<8x8xf32, #tpu.memory_space<vmem>>, vector<8x8xf32>
    tpu.vector_store %arg4[%c0_8, %c0_9], %43 {strides = array<i32>} : memref<8x8xf32, #tpu.memory_space<vmem>>, vector<8x8xf32>,
    %c0_i32_10 = arith.constant 0 : i32
    %c0_i32_11 = arith.constant 0 : i32
    %45 = arith.subi %11, %c0_i32_11 : i32
    %46 = arith.addi %c0_i32_11, %45 : i32
    %c1_i32_12 = arith.constant 1 : i32
    scf.for %arg5 = %c0_i32_11 to %46 step %c1_i32_12  : i32 {
      %c0_25 = arith.constant 0 : index
      %c0_26 = arith.constant 0 : index
      %76 = vector.load %arg4[%c0_25, %c0_26] : memref<8x8xf32, #tpu.memory_space<vmem>>, vector<8x8xf32>
      %77 = vector.broadcast %arg5 : i32 to vector<8x1xi32>
      %78 = arith.cmpi eq, %5, %77 : vector<8x1xi32>
      %79 = arith.extui %78 : vector<8x1xi1> to vector<8x1xi32>
      %80 = arith.sitofp %79 : vector<8x1xi32> to vector<8x1xf32>
      %cst_27 = arith.constant dense<0.000000e+00> : vector<8x1xf32>
      %81 = tpu.matmul %76, %80, %cst_27 {dimension_numbers = #tpu.dot_dimension_numbers<[1], [0], [0], [1], [0, 0, 1, 1], [], []>, precision = #tpu.contract_precision<fp32>} : vector<8x8xf32>, vector<8x1xf32>, vector<8x1xf32> -> vector<8x1xf32>
      %82 = arith.mulf %81, %80 : vector<8x1xf32>
      %83 = vector.shape_cast %82 : vector<8x1xf32> to vector<1x8x1xf32>
      %cst_28 = arith.constant dense<0.000000e+00> : vector<1xf32>
      %84 = vector.multi_reduction <add>, %83, %cst_28 [1, 2] : vector<1x8x1xf32> to vector<1xf32>
      %85 = vector.shape_cast %84 : vector<1xf32> to vector<1x1x1xf32>
      %86 = vector.extract %85[0, 0, 0] : f32 from vector<1x1x1xf32>
      %cst_29 = arith.constant 1.000000e+00 : f32
      %87 = arith.divf %cst_29, %86 : f32
      %88 = arith.index_cast %arg5 : i32 to index
      %c0_30 = arith.constant 0 : index
      %89 = vector.load %arg4[%88, %c0_30] : memref<8x8xf32, #tpu.memory_space<vmem>>, vector<1x8xf32>
      %90 = vector.broadcast %87 : f32 to vector<1x8xf32>
      %91 = arith.mulf %89, %90 : vector<1x8xf32>
      %92 = vector.broadcast %arg5 : i32 to vector<1x8xi32>
      %93 = arith.cmpi eq, %6, %92 : vector<1x8xi32>
      %cst_31 = arith.constant 1.000000e+00 : f32
      %94 = arith.addf %cst_31, %87 : f32
      %95 = vector.broadcast %94 : f32 to vector<1x8xf32>
      %96 = arith.select %93, %95, %91 : vector<1x8xi1>, vector<1x8xf32>
      %97 = vector.broadcast %arg5 : i32 to vector<8x1xi32>
      %98 = arith.cmpi eq, %5, %97 : vector<8x1xi32>
      %cst_32 = arith.constant 1.000000e+00 : f32
      %99 = arith.subf %86, %cst_32 : f32
      %100 = vector.broadcast %99 : f32 to vector<8x1xf32>
      %101 = arith.select %98, %100, %81 : vector<8x1xi1>, vector<8x1xf32>
      %102 = vector.broadcast %101 : vector<8x1xf32> to vector<8x8xf32>
      %103 = vector.broadcast %96 : vector<1x8xf32> to vector<8x8xf32>
      %104 = arith.mulf %102, %103 : vector<8x8xf32>
      %105 = arith.subf %76, %104 : vector<8x8xf32>
      %c0_33 = arith.constant 0 : index
      %c0_34 = arith.constant 0 : index
      %106 = vector.load %arg4[%c0_33, %c0_34] : memref<8x8xf32, #tpu.memory_space<vmem>>, vector<8x8xf32>
      tpu.vector_store %arg4[%c0_33, %c0_34], %105 {strides = array<i32>} : memref<8x8xf32, #tpu.memory_space<vmem>>, vector<8x8xf32>,
    }
    %c0_13 = arith.constant 0 : index
    %c0_14 = arith.constant 0 : index
    %47 = vector.load %arg4[%c0_13, %c0_14] : memref<8x8xf32, #tpu.memory_space<vmem>>, vector<8x8xf32>
    %cst_15 = arith.constant 0.000000e+00 : f32
    %48 = vector.broadcast %cst_15 : f32 to vector<8x8xf32>
    %49 = arith.select %2, %47, %48 : vector<8x8xi1>, vector<8x8xf32>
    %cst_16 = arith.constant dense<0.000000e+00> : vector<8xf32>
    %50 = vector.multi_reduction <add>, %49, %cst_16 [0] : vector<8x8xf32> to vector<8xf32>
    %51 = vector.shape_cast %50 : vector<8xf32> to vector<1x8xf32>
    %52 = vector.broadcast %51 : vector<1x8xf32> to vector<8x8xf32>
    %53 = arith.mulf %15, %52 : vector<8x8xf32>
    %54 = tpu.transpose %47, [1, 0] : vector<8x8xf32> -> vector<8x8xf32>
    %55 = arith.mulf %15, %54 : vector<8x8xf32>
    %c0_i32_17 = arith.constant 0 : i32
    %56 = vector.broadcast %c0_i32_17 : i32 to vector<8x8xi32>
    %57 = arith.cmpi eq, %1, %56 : vector<8x8xi32>
    %cst_18 = arith.constant 0.000000e+00 : f32
    %58 = vector.broadcast %cst_18 : f32 to vector<8x8xf32>
    %59 = arith.select %57, %58, %53 : vector<8x8xi1>, vector<8x8xf32>
    %c0_i32_19 = arith.constant 0 : i32
    %60 = vector.broadcast %c0_i32_19 : i32 to vector<8x8xi32>
    %61 = arith.cmpi eq, %0, %60 : vector<8x8xi32>
    %cst_20 = arith.constant 0.000000e+00 : f32
    %62 = vector.broadcast %cst_20 : f32 to vector<8x8xf32>
    %63 = arith.select %61, %62, %55 : vector<8x8xi1>, vector<8x8xf32>
    %64 = arith.subf %59, %63 : vector<8x8xf32>
    %65 = arith.mulf %4, %15 : vector<8x8xf32>
    %66 = vector.extract_strided_slice %47 {offsets = [0, 0], sizes = [8, 1], strides = [1, 1]} : vector<8x8xf32> to vector<8x1xf32>
    %67 = vector.broadcast %66 : vector<8x1xf32> to vector<8x8xf32>
    %68 = arith.mulf %65, %67 : vector<8x8xf32>
    %69 = arith.addf %64, %68 : vector<8x8xf32>
    %cst_21 = arith.constant 0.000000e+00 : f32
    %70 = vector.broadcast %cst_21 : f32 to vector<8x8xf32>
    %71 = arith.select %20, %69, %70 : vector<8x8xi1>, vector<8x8xf32>
    %72 = arith.index_cast %c0_i32 : i32 to index
    %c0_22 = arith.constant 0 : index
    %c0_23 = arith.constant 0 : index
    %73 = vector.load %arg3[%72, %c0_22, %c0_23] : memref<1x8x8xf32, #tpu.memory_space<vmem>>, vector<1x8x8xf32>
    %74 = vector.shape_cast %73 : vector<1x8x8xf32> to vector<8x8xf32>
    %75 = vector.shape_cast %71 : vector<8x8xf32> to vector<1x8x8xf32>
    tpu.vector_store %arg3[%72, %c0_22, %c0_23], %75 {strides = array<i32>} : memref<1x8x8xf32, #tpu.memory_space<vmem>>, vector<1x8x8xf32>,
    %c1_i32_24 = arith.constant 1 : i32
    return
  }
  func.func @transform_0(%arg0: i32, %arg1: memref<2xi32, #tpu.memory_space<smem>>) -> (i32, i32, i32) {
    %c0_i32 = arith.constant 0 : i32
    %c0_i32_0 = arith.constant 0 : i32
    %c0_i32_1 = arith.constant 0 : i32
    return %arg0, %c0_i32, %c0_i32_0 : i32, i32, i32
  }
  func.func @transform_1(%arg0: i32, %arg1: memref<2xi32, #tpu.memory_space<smem>>) -> (i32, i32, i32) {
    %c0_i32 = arith.constant 0 : i32
    %c0_i32_0 = arith.constant 0 : i32
    %c0_i32_1 = arith.constant 0 : i32
    return %arg0, %c0_i32, %c0_i32_0 : i32, i32, i32
  }
}

</mosaic_0001>

<bundles_post_ra>
// kernel: tpu_custom_call.1
= control target key start
LH: loop header
LB: loop body
LE: loop exit
PB: predicated region body
PF: predicated region fallthrough
CT: control target
= control target key end

     0   :  { %s1401_s0 = inlined_call_operand.hbm [shape: s32[2], index: 0, kind: input, shape index: {}]   ;;  %s1402_s1 = inlined_call_operand.hbm [shape: f32[2,8,8], index: 1, kind: input, shape index: {}]   ;;  %s1403_s2 = inlined_call_operand.hbm [shape: f32[2,8,8], index: 2, kind: output, shape index: {}]  }
   0x1   :  { %s971_s11 = scalar_lea.hbm %s1401_s0, 16 }
   0x2   :  { %p972_p0 = scmp.ne.s32.totalorder %s1401_s0, %s971_s11  ;;  %p975_p1 = scmp.lt.u32.totalorder %s971_s11, %s1401_s0 }
   0x4   :  { %p977_p2 = pnand %p975_p1, %p972_p0 }
   0x6   :  { %980 = shalt.err (!%p977_p2)  }
   0x7   :  { %s1089_s16 = smov [#allocation4]  }
   0x8   :  { %8 = dma.hbm_to_smem %s1401_s0, 16, %s1089_s16, [#allocation3] }
   0x9   :  { %1059 = dma.done.wait [#allocation3], 16 }
   0xa   :  { %1060 = vsyncadd [#allocation3], 4294967280 }
   0xb   :  { %10 = sfence }
   0xc   :  { %11 = vsyncpa [#allocation6], 0 }
   0xd   :  { %13 = vsyncpa [#allocation6 + $0x1], 0 }
   0xe   :  { %14 = vsyncpa [#allocation7], 0 }
   0xf   :  { %16 = vsyncpa [#allocation7 + $0x1], 0  ;;  %s1126_s19 = smov 0   ;;  %s1128_s20 = smov 0  }
  0x10   :  { %s1130_s21 = smov 0   ;;  %s1132_s22 = smov 0  }
  0x11 LB: > { %s1147_s0 = sadd.s32 4294967295, %s1083_s22   ;;  %s826_s23 = sadd.s32 4294967294, %s1083_s22   ;;  %s1083_s22 = sphi %s1132_s22, %s1422_s22   ;;  %s1079_s21 = sphi %s1130_s21, %s1421_s21   ;;  %s1075_s20 = sphi %s1128_s20, %s1420_s20   ;;  %s1071_s19 = sphi %s1126_s19, %s1419_s19  }
  0x12   : > { %s1151_s24 = sadd.s32 1, %s1083_s22   ;;  %s29_s25 = sadd.s32 1, %s1079_s21 }
  0x13   : > { %s26_s26 = ssub.s32 %s1083_s22, %s1151_s24  ;;  %p36_p3 = scmp.ne.s32.totalorder %s1079_s21, %s1075_s20 }
  0x14   : > { %p27_p4 = scmp.eq.s32.totalorder %s26_s26, 0  ;;  %p37_p5 = scmp.eq.s32.totalorder %s1083_s22, 0 }
  0x15   : > { %p42_p6 = scmp.ne.s32.totalorder %s1075_s20, %s1071_s19  ;;  %p43_p7 = scmp.eq.s32.totalorder %s1147_s0, 0 }
  0x16   : > { %s1163_s27 = scalar_select %p27_p4, %s1079_s21, %s29_s25  }
  0x17   : > { %p1165_p8 = por %p37_p5, %p36_p3  ;;  %p1169_p9 = por %p43_p7, %p42_p6 }
  0x18   : > { %p66_p10 = scmp.eq.s32.totalorder %s1147_s0, 1  ;;  %p72_p11 = scmp.eq.s32.totalorder %s826_s23, 1 }
  0x19   : > { %p915_p13 = scmp.lt.s32.totalorder %s1083_s22, 2  ;;  %s92_s4 = sand.u32 1, %s1079_s21  }
  0x1a   : > { %p1176_p0 = por %p66_p10, %p36_p3  ;;  %p1180_p1 = por %p72_p11, %p42_p6 }
  0x1b   : > { %s830_s5 = sshll.u32 %s1083_s22, 7  ;;  %s829_s6 = sshll.u32 %s92_s4, 3 }
  0x1c   : > { %s1407_s30 = scalar_select %p1176_p0, 1, 0 }
  0x1d   : > { %s1408_s3 = scalar_select %p1180_p1, 1, 0 }
  0x1e   : > { %s1189_s9 = scalar_lea.hbm %s1402_s1, %s830_s5  ;;  %s96_s10 = scalar_lea.vmem [#allocation5], %s829_s6 }
  0x1f   : > { %s103_s11 = sshll.u32 %s96_s10, 4  ;;  %p1193_p2 = pnand %p915_p13, %p1165_p8  ;;  %s1197_s11 = int_to_ptr.vmem [resolvable:$true] %s103_s11 }
  0x20   : > { %s93_s13 = scalar_lea.sflag [#allocation6], %s92_s4  ;;  %s981_s14 = scalar_lea.hbm %s1189_s9, 128 }
  0x21   : > { %p982_p5 = scmp.ne.s32.totalorder %s1189_s9, %s981_s14  ;;  %p983_p6 = pneg %p1193_p2 }
  0x22   : > { %s986_s17 = scalar_lea.hbm %s1402_s1, 256  ;;  %p987_p8 = scmp.lt.u32.totalorder %s1189_s9, %s1402_s1 }
  0x23   : > { %p984_p7 = pnand %p983_p6, %p982_p5  ;;  %p988_p11 = scmp.lt.u32.totalorder %s986_s17, %s981_s14 }
  0x24   : > { %p990_p12 = scmp.lt.u32.totalorder %s981_s14, %s1189_s9 }
  0x25   : > { %p985_p10 = pneg %p984_p7  ;;  %p989_p13 = por %p988_p11, %p987_p8 }
  0x27   : > { %p991_p3 = por %p990_p12, %p989_p13 }
  0x29   : > { %p992_p4 = pnand %p991_p3, %p985_p10 }
  0x2b   : > { %995 = shalt.err (!%p992_p4)
}
  0x2c   : > { %s996_s25 = scalar_lea.vmem %s1197_s11, 128  ;;  %s1090_s26 = smov [#allocation5]  }
  0x2d   : > { %p997_p5 = scmp.ne.s32.totalorder %s1197_s11, %s996_s25  ;;  %s1001_s28 = sshll.u32 %s1090_s26, 4  ;;  %s1002_s28 = int_to_ptr.vmem [resolvable:$false] %s1001_s28 }
  0x2e   : > { %s1003_s4 = scalar_lea.vmem %s1002_s28, 256  ;;  %p1004_p0 = scmp.lt.s32.totalorder %s1197_s11, %s1002_s28 }
  0x2f   : > { %p999_p7 = pnand %p997_p5, %p983_p6  ;;  %p1005_p8 = scmp.lt.s32.totalorder %s1003_s4, %s996_s25 }
  0x31   : > { %p1000_p1 = pneg %p999_p7  ;;  %p1006_p11 = por %p1005_p8, %p1004_p0 }
  0x33   : > { %p1007_p12 = pnand %p1006_p11, %p1000_p1 }
  0x35   : > { %1010 = shalt.err (!%p1007_p12)
}
  0x36   : > { %910 = dma.hbm_to_vmem [thread:$0]  (!%p1193_p2), %s1189_s9, 128, %s1197_s11, %s93_s13  }
  0x37   : > { %p1410_p3 = scmp.lt.s32.totalorder %s1083_s22, 3  ;;  %p1411_p4 = scmp.ge.s32.totalorder %s1083_s22, 1 }
  0x39   : > { %p109_p6 = pnand %p1411_p4, %p1410_p3 }
  0x3a   : > { %s1231_s5 = sand.u32 (!%p109_p6), 1, %s1075_s20  }
  0x3b   : > { %112 = sbr.rel (%p109_p6) target bundleno = 884 (0x374), region = 24  ;;  %s832_s6 = sshll.u32 (!%p109_p6), %s1231_s5, 3 }
  0x3c   : > { %s115_s7 = scalar_lea.sflag (!%p109_p6), [#allocation6], %s1231_s5  ;;  %s118_s8 = scalar_lea.vmem (!%p109_p6), [#allocation5], %s832_s6 }
  0x42   : > { %1062 = dma.done.wait (%p1169_p9), %s115_s7, 128  }
  0x43   : > { %1064 = vsyncadd (%p1169_p9), %s115_s7, 4294967168  ;;  %s1242_s9 = sld [smem:[#allocation4 + %s1147_s0]]  ;;  %v137_v0 = vlaneseq  ;;  %v147_v1 = vld [vmem:[%s118_s8] sm:$0xff]  ;;  %vm1091_vm3 = vmmov 1   ;;  %vm158_vm7 = vcmask 64512   ;;  %v1092_v23 = vmov 0.0  }
  0x44   : > { %v148_v2 = vmul.f32 1.442695, %v147_v1  ;;  %s1290_s29 = scalar_lea.vmem [#allocation8], %s832_s6 }
  0x45   : > { %v1245_v3 = vshrl.u32 %v137_v0, 7  ;;  %v1247_v4 = vand.u32 127, %v137_v0 }
  0x46   : > { %965 = vpow2.f32 %v148_v2 }
  0x47   : > { %vm141_vm0 = vcmp.eq.s32.totalorder %v1245_v3, %v1247_v4  ;;  %vm177_vm8 = vcmp.eq.s32.totalorder %v1245_v3, 0 }
  0x48   : > { %vm154_vm4 = vmxor %vm141_vm0, %vm1091_vm3  ;;  %v1278_v24 = vsel %vm141_vm0, 1.0, %v1092_v23 }
  0x49   : > { %p145_p0 = scmp.lt.s32.totalorder %s1242_s9, 8  ;;  %p845_p9 = scmp.le.s32.totalorder %s1242_s9, 0 }
  0x4a   : > { %s1293_s11 = smov (!%p845_p9), 0  }
  0x4b   : > { %s1250_s10 = scalar_select %p145_p0, %s1242_s9, 8 }
  0x4d   : > { %v150_v5 = vstv %s1250_s10 }
  0x4e   : > { %vm151_vm1 = vcmp.lt.s32.totalorder %v1245_v3, %v150_v5  ;;  %vm152_vm2 = vcmp.lt.s32.totalorder %v1247_v4, %v150_v5 }
  0x4f   : > { %vm1260_vm5 = vmand %vm151_vm1, %vm152_vm2 }
  0x50   : > { %v1264_v7 = vpop.eup %965  ;;  %vm155_vm6 = vmand %vm1260_vm5, %vm154_vm4 }
  0x51   : > { %v156_v8 = vadd.f32 1e-05, %v1264_v7  ;;  %v169_v9 = vsel %vm141_vm0, %v1264_v7, 0.0 }
  0x52   : > { %v170_v10 = vsel %vm158_vm7, %v169_v9, 0.0 }
  0x53   : > { %v157_v11 = vsel %vm155_vm6, %v156_v8, 0.0  ;;  %v171_v12 = vrot.slane %v170_v10, 4 }
  0x54   : > { %v159_v13 = vsel %vm158_vm7, %v157_v11, 0.0  ;;  %v166_v26 = vsub.f32 0.0, %v157_v11 }
  0x55   : > { %v160_v14 = vrot.slane %v159_v13, 4  ;;  %v172_v15 = vadd.f32 %v171_v12, %v170_v10 }
  0x57   : > { %v161_v16 = vadd.f32 %v160_v14, %v159_v13  ;;  %v173_v17 = vrot.slane %v172_v15, 2 }
  0x59   : > { %v162_v18 = vrot.slane %v161_v16, 2  ;;  %v174_v19 = vadd.f32 %v173_v17, %v172_v15 }
  0x5b   : > { %v163_v20 = vadd.f32 %v162_v18, %v161_v16  ;;  %v175_v22 = vrot.slane %v174_v19, 1 }
  0x5d   : > { %v164_v21 = vrot.slane %v163_v20, 1  ;;  %v176_v28 = vadd.f32 %v175_v22, %v174_v19 }
  0x5f   : > { %v165_v25 = vadd.f32 %v164_v21, %v163_v20 }
  0x61   : > { %v167_v27 = vmul.f32 %v1278_v24, %v165_v25  ;;  %799 = sbr.rel (%p845_p9) target bundleno = 696 (0x2b8), region = 71 }
  0x63   : > { %v168_v29 = vadd.f32 %v167_v27, %v166_v26 }
  0x65   : > { %v178_v30 = vsel %vm177_vm8, %v176_v28, %v168_v29 }
  0x66   : > { %v179_v31 = vsel %vm1260_vm5, %v178_v30, %v1278_v24 }
  0x67   : > { %180 = vst.msk [vmem:[#allocation2] sm:$0xff] %vm158_vm7, %v179_v31 }
  0x68 LB: >> { %v1093_v33 = vmov 0.0   ;;  %vm1094_vm9 = vmmov 0   ;;  %v188_v35 = vstv %s1087_s11  ;;  %v1095_v39 = vmov 1.0   ;;  %s656_s15 = scalar_lea.vmem [#allocation2], %s1087_s11  ;;  %s184_s11 = sadd.s32 1, %s1087_s11   ;;  %s1087_s11 = sphi %s1293_s11, %s184_s11  }
  0x69   : >> { %875 = vmatprep.subr.mxu0 %v1093_v33  ;;  %877 = vmatprep.mubr.msk.f32.mxu0 %vm1094_vm9, %v1093_v33  ;;  %vm1308_vm10 = vcmp.eq.s32.totalorder %v1245_v3, %v188_v35  ;;  %vm642_vm11 = vcmask 7168   ;;  %v1096_v55 = vmov 0   ;;  %vm660_vm12 = vcmp.eq.s32.totalorder %v1247_v4, %v188_v35  ;;  %p183_p1 = scmp.ge.s32.totalorder %s184_s11, %s1250_s10 }
  0x6a   : >> { %860 = vmatprep.subr.mxu1 %v1093_v33  ;;  %862 = vmatprep.mubr.msk.f32.mxu1 %vm1094_vm9, %v1093_v33  ;;  %v836_v38 = vsel %vm1308_vm10, 1.0, %v1093_v33  ;;  %v674_v11 = vsub.s32 0, %v1245_v3 }
  0x6b   : >> { %876 = vmatpush3.msk.msra.mxu0 %vm1308_vm10, %v1095_v39  ;;  %861 = vmatpush3.msk.msra.mxu1 %vm1308_vm10, %v1095_v39  ;;  %v273_v41 = vsub.f32 %v836_v38, %v836_v38 }
  0x6c   : >> { %865 = vmatprep.subr.mxu1 %v1093_v33  ;;  %880 = vmatprep.subr.mxu0 %v1093_v33 }
  0x6d   : >> { %v274_v43 = vand.u32 4294901760, %v273_v41  ;;  %967 = vset.pattern.permute.xlu0 %v1096_v55 }
  0x6e   : >> { %v1298_v32 = vld [vmem:[#allocation2] sm:$0xff] }
  0x6f   : >> { %v193_v34 = vsel %vm158_vm7, %v1298_v32, 0  ;;  %v275_v45 = vsub.f32 %v273_v41, %v274_v43  ;;  %v657_v5 = vld [vmem:[%s656_s15] sm:$0x1] }
  0x70   : >> { %v261_v36 = vand.u32 4294901760, %v193_v34 }
  0x71   : >> { %v276_v47 = vand.u32 4294901760, %v275_v45 }
  0x72   : >> { %v262_v40 = vsub.f32 %v193_v34, %v261_v36 }
  0x74   : >> { %v263_v42 = vand.u32 4294901760, %v262_v40 }
  0x76   : >> { %878 = vmatmul.mubr.f32.vlgmr.msra.gmra.mrb[0].mxu0 %v263_v42  ;;  %v264_v44 = vsub.f32 %v262_v40, %v263_v42 }
  0x77   : >> { %881 = vmatpush3.msra.mxu0 %v274_v43  ;;  %882 = vmatprep.mubr.msk.f32.mxu0 %vm1094_vm9, %v1093_v33 }
  0x78   : >> { %v265_v46 = vand.u32 4294901760, %v264_v44  ;;  %885 = vmatprep.subr.mxu0 %v1093_v33 }
  0x7a   : >> { %863 = vmatmul.mubr.f32.vlgmr.msra.gmra.mrb[0].mxu1 %v265_v46 }
  0x7b   : >> { %866 = vmatpush3.msra.mxu1 %v276_v47  ;;  %867 = vmatprep.mubr.msk.f32.mxu1 %vm1094_vm9, %v1093_v33 }
  0x7c   : >> { %870 = vmatprep.subr.mxu1 %v1093_v33 }
  0x7e   : >> { %883 = vmatmul.mubr.f32.vlgmr.msra.gmra.mrb[0].mxu0 %v261_v36 }
  0x7f   : >> { %886 = vmatpush3.msk.msra.mxu0 %vm1308_vm10, %v1095_v39  ;;  %887 = vmatprep.mubr.msk.f32.mxu0 %vm1094_vm9, %v1093_v33 }
  0x82   : >> { %868 = vmatmul.mubr.f32.vlgmr.msra.gmra.mrb[0].mxu1 %v261_v36 }
  0x83   : >> { %871 = vmatpush3.msra.mxu1 %v273_v41  ;;  %872 = vmatprep.mubr.msk.f32.mxu1 %vm1094_vm9, %v1093_v33 }
  0x86   : >> { %888 = vmatmul.mubr.f32.vlgmr.msra.gmra.mrb[0].mxu0 %v261_v36 }
  0x8a   : >> { %873 = vmatmul.mubr.f32.vlgmr.msra.gmra.mrb[0].mxu1 %v262_v40 }
 0x159   : >> { %v637_v48 = vpop.f32.mrb[0].mxu0 }
 0x15a   : >> { %v889_v49 = vpop.f32.mrb[1].mxu0 }
 0x15d   : >> { %v417_v50 = vpop.f32.mrb[0].mxu1 }
 0x15e   : >> { %v890_v51 = vadd.f32 %v637_v48, %v417_v50  ;;  %v874_v52 = vpop.f32.mrb[1].mxu1 }
 0x160   : >> { %v641_v53 = vmul.f32 %v890_v51, %v836_v38 }
 0x162   : >> { %v643_v54 = vsel %vm642_vm11, %v641_v53, 0.0 }
 0x163   : >> { %644 = vadd.xlane.f32.xlu0 %v643_v54 }
 0x1f0   : >> { %v645_v56 = vpop.xlane.xlu0 %644 }
 0x1f1   : >> { %v646_v57 = vrot.slane %v645_v56, 4 }
 0x1f3   : >> { %v647_v58 = vadd.f32 %v646_v57, %v645_v56 }
 0x1f5   : >> { %v648_v59 = vrot.slane %v647_v58, 2 }
 0x1f7   : >> { %v649_v60 = vadd.f32 %v648_v59, %v647_v58 }
 0x1f9   : >> { %v650_v61 = vrot.slane %v649_v60, 1 }
 0x1fb   : >> { %v651_v62 = vadd.f32 %v650_v61, %v649_v60 }
 0x1fd   : >> { %899 = vpush %v651_v62 }
 0x22e   : >> { %s900_s12 = spop %899 }
 0x22f   : >> { %v653_v63 = vstv %s900_s12  ;;  %s840_s13 = sadd.f32 -1.0, %s900_s12 }
 0x230   : >> { %968 = vrcp.f32 %v653_v63 }
 0x231   : >> { %v665_v0 = vstv %s840_s13 }
 0x232   : >> { %v666_v1 = vsel %vm1308_vm10, %v665_v0, %v890_v51 }
 0x233   : >> { %669 = vperm.xlu0 %967, %v666_v1  }
 0x23a   : >> { %v969_v2 = vpop.eup %968 }
 0x23b   : >> { %901 = vpush %v969_v2 }
 0x26c   : >> { %s902_s14 = spop %901 }
 0x26d   : >> { %v658_v8 = vstv %s902_s14  ;;  %s661_s16 = sadd.f32 1.0, %s902_s14 }
 0x26e   : >> { %v659_v9 = vmul.f32 %v658_v8, %v657_v5 }
 0x26f   : >> { %v662_v10 = vstv %s661_s16 }
 0x270   : >> { %v663_v12 = vsel %vm660_vm12, %v662_v10, %v659_v9 }
 0x271   : >> { %v675_v13 = vrot.slane %v663_v12, %v674_v11 }
 0x2b1   : > { %186 = sbr.rel (!%p183_p1) target bundleno = 104 (0x68), region = 77 }
 0x2b2   : >> { %v670_v14 = vpop.permute.xlu0 %669 }
 0x2b3   : >> { %v676_v15 = vmul.f32 %v675_v13, %v670_v14 }
 0x2b5   : >> { %v677_v16 = vsub.f32 %v1298_v32, %v676_v15 }
 0x2b7   : >> { %678 = vst.msk [vmem:[#allocation2] sm:$0xff] %vm158_vm7, %v677_v16 }
 0x2b8 PF: > { %v1097_v18 = vmov 0   ;;  %vm722_vm13 = vcmp.eq.s32.totalorder %v1247_v4, 0  ;;  %v726_v30 = vmul.f32 %v1264_v7, %v1278_v24  ;;  %s842_s17 = sshll.u32 %s1147_s0, 7  ;;  %s750_s18 = sshll.u32 %s1290_s29, 4  ;;  %s1355_s18 = int_to_ptr.vmem [resolvable:$true] %s750_s18 }
 0x2b9   : > { %970 = vset.pattern.permute.xlu0 %v1097_v18  ;;  %s1353_s26 = scalar_lea.hbm %s1403_s2, %s842_s17  ;;  %s737_s28 = scalar_lea.sflag [#allocation7], %s1231_s5 }
 0x2ba   : > { %s1011_s4 = scalar_lea.vmem %s1355_s18, 128  ;;  %p1416_p10 = scmp.ne.s32.totalorder %s1407_s30, 0 }
 0x2bb   : > { %p1012_p2 = scmp.ne.s32.totalorder %s1355_s18, %s1011_s4  ;;  %s1098_s0 = smov [#allocation8]  }
 0x2bc   : > { %s1015_s6 = sshll.u32 %s1098_s0, 4  ;;  %s1016_s6 = int_to_ptr.vmem [resolvable:$false] %s1015_s6 }
 0x2bd   : > { %p1013_p13 = pnand %p1012_p2, %p1416_p10  ;;  %s1017_s7 = scalar_lea.vmem %s1016_s6, 256 }
 0x2be   : > { %v679_v17 = vld [vmem:[#allocation2] sm:$0xff]  ;;  %p1018_p7 = scmp.lt.s32.totalorder %s1355_s18, %s1016_s6  ;;  %p1019_p8 = scmp.lt.s32.totalorder %s1017_s7, %s1011_s4 }
 0x2bf   : > { %729 = vperm.xlu0 %970, %v679_v17   ;;  %v680_v19 = vsel %vm141_vm0, %v679_v17, 0.0  ;;  %p1014_p5 = pneg %p1013_p13 }
 0x2c0   : > { %v681_v20 = vsel %vm158_vm7, %v680_v19, 0.0  ;;  %p1020_p11 = por %p1019_p8, %p1018_p7 }
 0x2c1   : > { %v682_v21 = vrot.slane %v681_v20, 4 }
 0x2c2   : > { %p1021_p12 = pnand %p1020_p11, %p1014_p5 }
 0x2c3   : > { %v683_v22 = vadd.f32 %v682_v21, %v681_v20 }
 0x2c5   : > { %v684_v23 = vrot.slane %v683_v22, 2 }
 0x2c7   : > { %v685_v25 = vadd.f32 %v684_v23, %v683_v22 }
 0x2c9   : > { %v686_v26 = vrot.slane %v685_v25, 1 }
 0x2cb   : > { %v687_v27 = vadd.f32 %v686_v26, %v685_v25 }
 0x2cd   : > { %v688_v29 = vmul.f32 %v1264_v7, %v687_v27 }
 0x2cf   : > { %v723_v33 = vsel %vm722_vm13, 0.0, %v688_v29 }
 0x2dd   : > { %689 = vxpose.xlu0.b32.start.end [1/1] (short) (narrow) %v679_v17, 8 }
 0x33e   : > { %v730_v28 = vpop.permute.xlu0 %729 }
 0x33f   : > { %v732_v35 = vmul.f32 %v730_v28, %v726_v30 }
 0x35d   : > { %v705_v31 = vpop.trf.xlu0 }
 0x35e   : > { %v721_v32 = vmul.f32 %v1264_v7, %v705_v31 }
 0x360   : > { %v724_v34 = vsel %vm177_vm8, 0.0, %v721_v32 }
 0x361   : > { %v725_v36 = vsub.f32 %v723_v33, %v724_v34 }
 0x363   : > { %v733_v37 = vadd.f32 %v732_v35, %v725_v36 }
 0x365   : > { %v734_v4 = vsel %vm1260_vm5, %v733_v37, 0.0 }
 0x366   : > { %735 = vst.msk [vmem:[%s1290_s29] sm:$0xff] %vm158_vm7, %v734_v4 }
 0x367   : > { %1024 = shalt.err (!%p1021_p12)
}
 0x368   : > { %s1025_s5 = scalar_lea.hbm %s1353_s26, 128  ;;  %s1029_s10 = scalar_lea.hbm %s1403_s2, 256 }
 0x369   : > { %p1026_p3 = scmp.ne.s32.totalorder %s1353_s26, %s1025_s5  ;;  %p1030_p0 = scmp.lt.u32.totalorder %s1353_s26, %s1403_s2 }
 0x36a   : > { %p1031_p9 = scmp.lt.u32.totalorder %s1029_s10, %s1025_s5  ;;  %p1033_p2 = scmp.lt.u32.totalorder %s1025_s5, %s1353_s26 }
 0x36b   : > { %p1027_p4 = pnand %p1026_p3, %p1416_p10 }
 0x36c   : > { %p1032_p1 = por %p1031_p9, %p1030_p0 }
 0x36d   : > { %p1028_p6 = pneg %p1027_p4 }
 0x36e   : > { %p1034_p13 = por %p1033_p2, %p1032_p1 }
 0x370   : > { %p1035_p5 = pnand %p1034_p13, %p1028_p6 }
 0x372   : > { %1038 = shalt.err (!%p1035_p5)
}
 0x373   : > { %905 = dma.vmem_to_hbm [thread:$0]  (%p1416_p10), %s1355_s18, 128, %s1353_s26, %s737_s28  }
 0x374 PF: > { %s762_s12 = sand.u32 1, %s1071_s19   ;;  %p1417_p7 = scmp.ne.s32.totalorder %s1408_s3, 0 }
 0x375   : > { %p1418_p8 = scmp.ge.s32.totalorder %s1083_s22, 2  ;;  %s763_s13 = scalar_lea.sflag [#allocation7], %s762_s12 }
 0x377   : > { %p912_p11 = pnand %p1418_p8, %p1417_p7 }
 0x379   : > { %1066 = dma.done.wait (!%p912_p11), %s763_s13, 128  }
 0x37a   : > { %1068 = vsyncadd (!%p912_p11), %s763_s13, 4294967168  ;;  %p19_p12 = scmp.ge.s32.totalorder %s1151_s24, 4   ;;  %s1419_s19 = smov %s1075_s20 }
 0x37b   : > { %s1420_s20 = smov %s1079_s21  ;;  %s1421_s21 = smov %s1163_s27 }
 0x37c   : > { %s1422_s22 = smov %s1151_s24  ;;  %21 = sbr.rel (!%p19_p12) target bundleno = 17 (0x11), region = 88 }
 0x383   :  { %768 = vsyncpa [#allocation6], 1 }
 0x384   :  { %770 = vsyncpa [#allocation6 + $0x1], 1 }
 0x385   :  { %771 = vsyncpa [#allocation7], 1 }
 0x386   :  { %773 = vsyncpa [#allocation7 + $0x1], 1 }

</bundles_post_ra>
